<compile_context>
chip_gen: v7x
topology: tpu7x:2x2x1
jax: 0.10.0
libtpu: 0.0.40
codegen_flags: <defaults>
</compile_context>

<pallas_src>
import functools

import jax
import jax.numpy as jnp
from jax import lax
from jax.experimental import pallas as pl
from jax.experimental.pallas import tpu as pltpu


def value_kernel(x_ref, mean_ref, inv_std_ref,
                 w1_ref, b1_ref, w2_ref, b2_ref, w3_ref, b3_ref,
                 o_ref, *, act_dtype):
    clip = 5.0

    # RunningNorm with the divide pre-folded into inv_std (pure VPU, f32).
    x = x_ref[...]                                           # [TILE_B, D] f32
    xn = jnp.clip((x - mean_ref[...]) * inv_std_ref[...], -clip, clip)
    xn = xn.astype(w1_ref.dtype)                             # bf16 MXU input

    # Layer 1, feature-major: contract w1 [H1, D] with xn [TILE_B, D] on D
    # -> h1_t [H1, TILE_B].  Expressed as a trans-B matmul so Mosaic drives the
    # MXU directly instead of us paying an explicit XLU transpose.
    h1_t = lax.dot_general(w1_ref[...], xn,
                           dimension_numbers=(((1,), (1,)), ((), ())),
                           preferred_element_type=jnp.float32)
    h1_t = jnp.tanh((h1_t + b1_ref[...]).astype(act_dtype))  # [H1, TILE_B]

    # Layer 2, feature-major: plain [H2, H1] @ [H1, TILE_B], f32 accumulate.
    h2_t = jnp.dot(w2_ref[...], h1_t.astype(w2_ref.dtype),
                   preferred_element_type=jnp.float32)
    h2_t = jnp.tanh((h2_t + b2_ref[...]).astype(act_dtype))  # [H2, TILE_B]

    # Value head: elementwise mul + sublane reduction (XLU) -> lane-dense
    # [1, TILE_B]; deliberately NOT an MXU matmul with a 1-wide output.
    v = (jnp.sum(h2_t.astype(jnp.float32) * w3_ref[...], axis=0, keepdims=True)
         + b3_ref[...])
    o_ref[...] = v.astype(o_ref.dtype)


def _tpu_kind():
    try:
        return jax.devices()[0].device_kind.lower()
    except Exception:
        return ""


def default_act_dtype():
    """bf16 tanh on v6e/v7x (bf16 EUP); f32 on v5e and older (no bf16 EUP/VPU)."""
    kind = _tpu_kind()
    return jnp.bfloat16 if ("v6" in kind or "v7" in kind) else jnp.float32


def _num_tensorcores():
    # v7x has 2 TensorCores per chip; v5e/v6e have 1.
    return 2 if "v7" in _tpu_kind() else 1


def _round_up(a, m):
    return (a + m - 1) // m * m


def value_forward(x, params, *, tile_b=1024, act_dtype=None):
    """x: [B, state_dim] float32 -> value: [B, 1] float32.

    tile_b: batch rows per grid step; must be a multiple of 128 (lane-dense
    (1, tile_b) output blocks).  Defaults to 1024 to amortize the ~0.35us
    per-grid-step pipeline overhead; it is clamped to the 128-rounded batch and
    shrunk so multi-TensorCore chips (v7x) get at least one grid step per core.
    """
    if tile_b <= 0 or tile_b % 128 != 0:
        raise ValueError("tile_b must be a positive multiple of 128")
    if act_dtype is None:
        act_dtype = default_act_dtype()

    B, D = x.shape
    H1 = params["w1"].shape[0]
    H2 = params["w2"].shape[0]

    num_tc = _num_tensorcores()
    per_core = max(128, _round_up(pl.cdiv(B, num_tc), 128))
    tile_b = max(128, min(tile_b, per_core))
    grid_b = pl.cdiv(B, tile_b)      # ragged last block handled by Pallas; no pad

    args = (x,
            params["rn_mean"], params["rn_inv_std"],
            params["w1"], params["b1"],
            params["w2"], params["b2"],
            params["w3"], params["b3"])

    const = lambda i: (0, 0)          # weights/stats: DMA'd once, VMEM-resident
    in_specs = [
        pl.BlockSpec((tile_b, D), lambda i: (i, 0)),        # x tile (pipelined)
        pl.BlockSpec((1, D), const),                        # rn_mean
        pl.BlockSpec((1, D), const),                        # rn_inv_std
        pl.BlockSpec((H1, D), const),                       # w1 [H1, D] bf16
        pl.BlockSpec((H1, 1), const),                       # b1 column f32
        pl.BlockSpec((H2, H1), const),                      # w2 [H2, H1] bf16
        pl.BlockSpec((H2, 1), const),                       # b2 column f32
        pl.BlockSpec((H2, 1), const),                       # w3 column f32
        pl.BlockSpec((1, 1), const),                        # b3 f32
    ]
    out_spec = pl.BlockSpec((1, tile_b), lambda i: (0, i))  # lane-dense output

    bytes_accessed = sum(int(a.size) * a.dtype.itemsize for a in args) + B * 4
    cost = pl.CostEstimate(
        flops=2 * B * (D * H1 + H1 * H2 + H2),
        transcendentals=B * (H1 + H2),
        bytes_accessed=int(bytes_accessed),
    )

    out = pl.pallas_call(
        functools.partial(value_kernel, act_dtype=act_dtype),
        out_shape=jax.ShapeDtypeStruct((1, B), jnp.float32),
        grid=(grid_b,),
        in_specs=in_specs,
        out_specs=out_spec,
        compiler_params=pltpu.CompilerParams(
            dimension_semantics=("parallel",)),   # shards batch across TCs on v7x
        cost_estimate=cost,
    )(*args)

    return out.reshape(B, 1)


def init_params(key, state_dim, hidden_size=(128, 128), weight_dtype=jnp.bfloat16):
    """Deterministic synthetic parameters mirroring Value.__init__ shapes."""
    ks = jax.random.split(key, 8)
    h1, h2 = hidden_size
    eps = 1e-8

    def linear_init(kw, kb, fan_in, fan_out):
        # PyTorch nn.Linear default init: U(-1/sqrt(fan_in), 1/sqrt(fan_in))
        bound = 1.0 / float(fan_in) ** 0.5
        w = jax.random.uniform(kw, (fan_out, fan_in), jnp.float32, -bound, bound)
        b = jax.random.uniform(kb, (fan_out,), jnp.float32, -bound, bound)
        return w, b

    w1, b1 = linear_init(ks[0], ks[1], state_dim, h1)   # [h1, state_dim]
    w2, b2 = linear_init(ks[2], ks[3], h1, h2)          # [h2, h1]
    w3, b3 = linear_init(ks[4], ks[5], h2, 1)           # [1, h2]
    w3 = w3 * 0.1        # value_head.weight.data.mul_(0.1)
    b3 = b3 * 0.0        # value_head.bias.data.mul_(0.0)

    rn_mean = 0.1 * jax.random.normal(ks[6], (1, state_dim), jnp.float32)
    rn_std = 1.0 + 0.1 * jnp.abs(jax.random.normal(ks[7], (1, state_dim), jnp.float32))

    return {
        "rn_mean": rn_mean,                              # [1, D]  f32
        "rn_inv_std": 1.0 / (rn_std + eps),              # [1, D]  f32 (pre-folded)
        "w1": w1.astype(weight_dtype),                   # [H1, D] bf16 (torch layout)
        "b1": b1.reshape(h1, 1),                         # [H1, 1] f32 column
        "w2": w2.astype(weight_dtype),                   # [H2, H1] bf16 (torch layout)
        "b2": b2.reshape(h2, 1),                         # [H2, 1] f32 column
        "w3": w3.reshape(h2, 1),                         # [H2, 1] f32 column
        "b3": b3.reshape(1, 1),                          # [1, 1]  f32
    }


def value_reference(x, params, act_dtype=jnp.float32):
    """Pure-JAX reference of the same forward pass (same bf16 weights / act dtype)."""
    xn = jnp.clip((x - params["rn_mean"]) * params["rn_inv_std"], -5.0, 5.0)
    w1, w2 = params["w1"], params["w2"]
    h1 = (jnp.dot(xn.astype(w1.dtype), w1.T, preferred_element_type=jnp.float32)
          + params["b1"].T)
    h1 = jnp.tanh(h1.astype(act_dtype))
    h2 = (jnp.dot(h1.astype(w2.dtype), w2.T, preferred_element_type=jnp.float32)
          + params["b2"].T)
    h2 = jnp.tanh(h2.astype(act_dtype))
    return (jnp.sum(h2.astype(jnp.float32) * params["w3"].T, axis=-1, keepdims=True)
            + params["b3"])


if __name__ == "__main__":
    key = jax.random.PRNGKey(0)
    k_param, k_x = jax.random.split(key)

    # Small deterministic test; B deliberately NOT a multiple of 128 so the
    # ragged-last-block (no-pad) path is exercised.  For real throughput run
    # B >= 4096 and sweep tile_b in 1024-2048.
    B, STATE_DIM = 200, 32
    params = init_params(k_param, STATE_DIM, hidden_size=(128, 128))
    x = jax.random.normal(k_x, (B, STATE_DIM), jnp.float32)

    act_dtype = default_act_dtype()
    out = value_forward(x, params, act_dtype=act_dtype)
    out = jax.block_until_ready(out)

    ref = value_reference(x, params, act_dtype=act_dtype)
    assert out.shape == (B, 1), out.shape
    max_err = float(jnp.max(jnp.abs(out - ref)))
    assert jnp.allclose(out, ref, atol=1e-3, rtol=1e-3), max_err

    print("KERNEL_OK")
</pallas_src>

<mosaic_0001>
module attributes {stable_mosaic.version = 11 : i64} {
  func.func @value_kernel(%arg0: i32, %arg1: memref<256x32xf32, #tpu.memory_space<vmem>>, %arg2: memref<1x32xf32, #tpu.memory_space<vmem>>, %arg3: memref<1x32xf32, #tpu.memory_space<vmem>>, %arg4: memref<128x32xbf16, #tpu.memory_space<vmem>>, %arg5: memref<128x1xf32, #tpu.memory_space<vmem>>, %arg6: memref<128x128xbf16, #tpu.memory_space<vmem>>, %arg7: memref<128x1xf32, #tpu.memory_space<vmem>>, %arg8: memref<128x1xf32, #tpu.memory_space<vmem>>, %arg9: memref<1x1xf32, #tpu.memory_space<vmem>>, %arg10: memref<1x256xf32, #tpu.memory_space<vmem>>) attributes {dimension_semantics = [#tpu.dimension_semantics<parallel>], iteration_bounds = array<i64: 1>, scalar_prefetch = 0 : i64, scratch_operands = 0 : i64, tpu.core_type = #tpu.core_type<tc>, window_params = [{transform_indices = @transform_0, window_bounds = array<i64: 256, 32>}, {pipeline_mode = #tpu.pipeline_mode<synchronous>, transform_indices = @transform_1, window_bounds = array<i64: 1, 32>}, {pipeline_mode = #tpu.pipeline_mode<synchronous>, transform_indices = @transform_2, window_bounds = array<i64: 1, 32>}, {pipeline_mode = #tpu.pipeline_mode<synchronous>, transform_indices = @transform_3, window_bounds = array<i64: 128, 32>}, {pipeline_mode = #tpu.pipeline_mode<synchronous>, transform_indices = @transform_4, window_bounds = array<i64: 128, 1>}, {pipeline_mode = #tpu.pipeline_mode<synchronous>, transform_indices = @transform_5, window_bounds = array<i64: 128, 128>}, {pipeline_mode = #tpu.pipeline_mode<synchronous>, transform_indices = @transform_6, window_bounds = array<i64: 128, 1>}, {pipeline_mode = #tpu.pipeline_mode<synchronous>, transform_indices = @transform_7, window_bounds = array<i64: 128, 1>}, {pipeline_mode = #tpu.pipeline_mode<synchronous>, transform_indices = @transform_8, window_bounds = array<i64: 1, 1>}, {transform_indices = @transform_9, window_bounds = array<i64: 1, 256>}]} {
    %c0 = arith.constant 0 : index
    %c0_0 = arith.constant 0 : index
    %0 = vector.load %arg1[%c0, %c0_0] : memref<256x32xf32, #tpu.memory_space<vmem>>, vector<256x32xf32>
    %c0_1 = arith.constant 0 : index
    %c0_2 = arith.constant 0 : index
    %1 = vector.load %arg2[%c0_1, %c0_2] : memref<1x32xf32, #tpu.memory_space<vmem>>, vector<1x32xf32>
    %2 = vector.broadcast %1 : vector<1x32xf32> to vector<256x32xf32>
    %3 = arith.subf %0, %2 : vector<256x32xf32>
    %c0_3 = arith.constant 0 : index
    %c0_4 = arith.constant 0 : index
    %4 = vector.load %arg3[%c0_3, %c0_4] : memref<1x32xf32, #tpu.memory_space<vmem>>, vector<1x32xf32>
    %5 = vector.broadcast %4 : vector<1x32xf32> to vector<256x32xf32>
    %6 = arith.mulf %3, %5 : vector<256x32xf32>
    %cst = arith.constant -5.000000e+00 : f32
    %cst_5 = arith.constant 5.000000e+00 : f32
    %7 = vector.broadcast %cst : f32 to vector<256x32xf32>
    %8 = arith.maximumf %7, %6 : vector<256x32xf32>
    %9 = vector.broadcast %cst_5 : f32 to vector<256x32xf32>
    %10 = arith.minimumf %9, %8 : vector<256x32xf32>
    %11 = arith.truncf %10 : vector<256x32xf32> to vector<256x32xbf16>
    %c0_6 = arith.constant 0 : index
    %c0_7 = arith.constant 0 : index
    %12 = vector.load %arg4[%c0_6, %c0_7] : memref<128x32xbf16, #tpu.memory_space<vmem>>, vector<128x32xbf16>
    %cst_8 = arith.constant dense<0.000000e+00> : vector<128x256xf32>
    %13 = tpu.matmul %12, %11, %cst_8 {dimension_numbers = #tpu.dot_dimension_numbers<[1], [1], [0], [0], [0, 0, 1, 0], [], []>} : vector<128x32xbf16>, vector<256x32xbf16>, vector<128x256xf32> -> vector<128x256xf32>
    %c0_9 = arith.constant 0 : index
    %c0_10 = arith.constant 0 : index
    %14 = vector.load %arg5[%c0_9, %c0_10] : memref<128x1xf32, #tpu.memory_space<vmem>>, vector<128x1xf32>
    %15 = vector.broadcast %14 : vector<128x1xf32> to vector<128x256xf32>
    %16 = arith.addf %13, %15 : vector<128x256xf32>
    %17 = math.tanh %16 : vector<128x256xf32>
    %c0_11 = arith.constant 0 : index
    %c0_12 = arith.constant 0 : index
    %18 = vector.load %arg6[%c0_11, %c0_12] : memref<128x128xbf16, #tpu.memory_space<vmem>>, vector<128x128xbf16>
    %19 = arith.truncf %17 : vector<128x256xf32> to vector<128x256xbf16>
    %cst_13 = arith.constant dense<0.000000e+00> : vector<128x256xf32>
    %20 = tpu.matmul %18, %19, %cst_13 {dimension_numbers = #tpu.dot_dimension_numbers<[1], [0], [0], [1], [0, 0, 1, 1], [], []>} : vector<128x128xbf16>, vector<128x256xbf16>, vector<128x256xf32> -> vector<128x256xf32>
    %c0_14 = arith.constant 0 : index
    %c0_15 = arith.constant 0 : index
    %21 = vector.load %arg7[%c0_14, %c0_15] : memref<128x1xf32, #tpu.memory_space<vmem>>, vector<128x1xf32>
    %22 = vector.broadcast %21 : vector<128x1xf32> to vector<128x256xf32>
    %23 = arith.addf %20, %22 : vector<128x256xf32>
    %24 = math.tanh %23 : vector<128x256xf32>
    %c0_16 = arith.constant 0 : index
    %c0_17 = arith.constant 0 : index
    %25 = vector.load %arg8[%c0_16, %c0_17] : memref<128x1xf32, #tpu.memory_space<vmem>>, vector<128x1xf32>
    %26 = vector.broadcast %25 : vector<128x1xf32> to vector<128x256xf32>
    %27 = arith.mulf %24, %26 : vector<128x256xf32>
    %cst_18 = arith.constant dense<0.000000e+00> : vector<256xf32>
    %28 = vector.multi_reduction <add>, %27, %cst_18 [0] : vector<128x256xf32> to vector<256xf32>
    %29 = vector.shape_cast %28 : vector<256xf32> to vector<1x256xf32>
    %c0_19 = arith.constant 0 : index
    %c0_20 = arith.constant 0 : index
    %30 = vector.load %arg9[%c0_19, %c0_20] : memref<1x1xf32, #tpu.memory_space<vmem>>, vector<1x1xf32>
    %31 = vector.broadcast %30 : vector<1x1xf32> to vector<1x256xf32>
    %32 = arith.addf %29, %31 : vector<1x256xf32>
    %c0_21 = arith.constant 0 : index
    %c0_22 = arith.constant 0 : index
    %33 = vector.load %arg10[%c0_21, %c0_22] : memref<1x256xf32, #tpu.memory_space<vmem>>, vector<1x256xf32>
    tpu.vector_store %arg10[%c0_21, %c0_22], %32 {strides = array<i32>} : memref<1x256xf32, #tpu.memory_space<vmem>>, vector<1x256xf32>,
    return
  }
  func.func @transform_0(%arg0: i32) -> (i32, i32) {
    %c0_i32 = arith.constant 0 : i32
    %c0_i32_0 = arith.constant 0 : i32
    return %arg0, %c0_i32 : i32, i32
  }
  func.func @transform_1(%arg0: i32) -> (i32, i32) {
    %c0_i32 = arith.constant 0 : i32
    %c0_i32_0 = arith.constant 0 : i32
    %c0_i32_1 = arith.constant 0 : i32
    return %c0_i32, %c0_i32_0 : i32, i32
  }
  func.func @transform_2(%arg0: i32) -> (i32, i32) {
    %c0_i32 = arith.constant 0 : i32
    %c0_i32_0 = arith.constant 0 : i32
    %c0_i32_1 = arith.constant 0 : i32
    return %c0_i32, %c0_i32_0 : i32, i32
  }
  func.func @transform_3(%arg0: i32) -> (i32, i32) {
    %c0_i32 = arith.constant 0 : i32
    %c0_i32_0 = arith.constant 0 : i32
    %c0_i32_1 = arith.constant 0 : i32
    return %c0_i32, %c0_i32_0 : i32, i32
  }
  func.func @transform_4(%arg0: i32) -> (i32, i32) {
    %c0_i32 = arith.constant 0 : i32
    %c0_i32_0 = arith.constant 0 : i32
    %c0_i32_1 = arith.constant 0 : i32
    return %c0_i32, %c0_i32_0 : i32, i32
  }
  func.func @transform_5(%arg0: i32) -> (i32, i32) {
    %c0_i32 = arith.constant 0 : i32
    %c0_i32_0 = arith.constant 0 : i32
    %c0_i32_1 = arith.constant 0 : i32
    return %c0_i32, %c0_i32_0 : i32, i32
  }
  func.func @transform_6(%arg0: i32) -> (i32, i32) {
    %c0_i32 = arith.constant 0 : i32
    %c0_i32_0 = arith.constant 0 : i32
    %c0_i32_1 = arith.constant 0 : i32
    return %c0_i32, %c0_i32_0 : i32, i32
  }
  func.func @transform_7(%arg0: i32) -> (i32, i32) {
    %c0_i32 = arith.constant 0 : i32
    %c0_i32_0 = arith.constant 0 : i32
    %c0_i32_1 = arith.constant 0 : i32
    return %c0_i32, %c0_i32_0 : i32, i32
  }
  func.func @transform_8(%arg0: i32) -> (i32, i32) {
    %c0_i32 = arith.constant 0 : i32
    %c0_i32_0 = arith.constant 0 : i32
    %c0_i32_1 = arith.constant 0 : i32
    return %c0_i32, %c0_i32_0 : i32, i32
  }
  func.func @transform_9(%arg0: i32) -> (i32, i32) {
    %c0_i32 = arith.constant 0 : i32
    %c0_i32_0 = arith.constant 0 : i32
    return %c0_i32, %arg0 : i32, i32
  }
}

</mosaic_0001>

<bundles_post_ra>
// kernel: tpu_custom_call.1
= control target key start
LH: loop header
LB: loop body
LE: loop exit
PB: predicated region body
PF: predicated region fallthrough
CT: control target
= control target key end

     0   :  { %s1911_s0 = inlined_call_operand.vmem [shape: f32[200,32], index: 0, kind: input, shape index: {}]   ;;  %s1912_s1 = inlined_call_operand.vmem [shape: f32[1,32], index: 1, kind: input, shape index: {}]   ;;  %s1913_s2 = inlined_call_operand.vmem [shape: f32[1,32], index: 2, kind: input, shape index: {}]   ;;  %s1914_s3 = inlined_call_operand.vmem [shape: bf16[128,32], index: 3, kind: input, shape index: {}]   ;;  %s1915_s4 = inlined_call_operand.vmem [shape: f32[128,1], index: 4, kind: input, shape index: {}]   ;;  %s1916_s5 = inlined_call_operand.vmem [shape: bf16[128,128], index: 5, kind: input, shape index: {}]   ;;  %s1917_s6 = inlined_call_operand.vmem [shape: f32[128,1], index: 6, kind: input, shape index: {}]   ;;  %s1918_s7 = inlined_call_operand.vmem [shape: f32[128,1], index: 7, kind: input, shape index: {}]   ;;  %s1919_s8 = inlined_call_operand.<no memory space> [shape: f32[1,1], index: 8, kind: input, shape index: {}]   ;;  %s1920_s9 = inlined_call_operand.hbm [shape: f32[1,200], index: 9, kind: output, shape index: {}]  }
   0x1   :  { %v14_v0 = vstv %s1919_s8 }
   0x2   :  { %15 = vst [vmem:[#allocation2] sm:$0x1] %v14_v0 }
   0x3   :  { %v52_v1 = vld [vmem:[%s1911_s0 + $0x80] sm:$0xff]  ;;  %v53_v2 = vld [vmem:[%s1911_s0 + $0x88] sm:$0xff]  ;;  %v1407_v9 = vmov 0   ;;  %vm378_vm0 = vcmask 261120   ;;  %v54_v12 = vld [vmem:[%s1911_s0 + $0x90] sm:$0xff] }
   0x4   :  { %v1472_v3 = vld [vmem:[%s1912_s1] ss:$0 sm:$0xff]  ;;  %v37_v8 = vld [vmem:[%s1911_s0 + $0x8] sm:$0xff]  ;;  %1237 = vset.pattern.permute.xlu0 %v1407_v9  ;;  %1238 = vset.pattern.permute.xlu1 %v1407_v9  ;;  %v55_v13 = vld [vmem:[%s1911_s0 + $0x98] sm:$0xff] }
   0x5   :  { %v91_v4 = vsub.f32 %v52_v1, %v1472_v3  ;;  %v92_v5 = vsub.f32 %v53_v2, %v1472_v3  ;;  %v1479_v6 = vld [vmem:[%s1913_s2] ss:$0 sm:$0xff]  ;;  %v76_v11 = vsub.f32 %v37_v8, %v1472_v3  ;;  %v38_v14 = vld [vmem:[%s1911_s0 + $0x10] sm:$0xff]  ;;  %804 = vmatprep.mubr.bf16.mxu1 %v1407_v9  ;;  %v93_v17 = vsub.f32 %v54_v12, %v1472_v3  ;;  %v39_v19 = vld [vmem:[%s1911_s0 + $0x18] sm:$0xff] }
   0x6   :  { %v36_v7 = vld [vmem:[%s1911_s0] sm:$0xff]  ;;  %v94_v18 = vsub.f32 %v55_v13, %v1472_v3  ;;  %v77_v22 = vsub.f32 %v38_v14, %v1472_v3  ;;  %v78_v23 = vsub.f32 %v39_v19, %v1472_v3  ;;  %v57_v29 = vld [vmem:[%s1911_s0 + $0xa8] sm:$0xff]  ;;  %v58_v40 = vld [vmem:[%s1911_s0 + $0xb0] sm:$0xff] }
   0x7   :  { %v75_v10 = vsub.f32 %v36_v7, %v1472_v3  ;;  %v130_v15 = vmul.f32 %v1479_v6, %v91_v4  ;;  %v131_v16 = vmul.f32 %v1479_v6, %v92_v5  ;;  %v115_v21 = vmul.f32 %v1479_v6, %v76_v11  ;;  %v56_v24 = vld [vmem:[%s1911_s0 + $0xa0] sm:$0xff]  ;;  %v41_v35 = vld [vmem:[%s1911_s0 + $0x28] sm:$0xff]  ;;  %v59_v49 = vld [vmem:[%s1911_s0 + $0xb8] sm:$0xff] }
   0x8   :  { %v132_v27 = vmul.f32 %v1479_v6, %v93_v17  ;;  %v133_v28 = vmul.f32 %v1479_v6, %v94_v18  ;;  %v116_v32 = vmul.f32 %v1479_v6, %v77_v22  ;;  %v117_v33 = vmul.f32 %v1479_v6, %v78_v23  ;;  %v40_v34 = vld [vmem:[%s1911_s0 + $0x20] sm:$0xff]  ;;  %v42_v55 = vld [vmem:[%s1911_s0 + $0x30] sm:$0xff]  ;;  %v43_v60 = vld [vmem:[%s1911_s0 + $0x38] sm:$0xff] }
   0x9   :  { %v114_v20 = vmul.f32 %v1479_v6, %v75_v10  ;;  %v1154_v25 = vclamps-f32 %v130_v15, 5.0  ;;  %v1155_v26 = vclamps-f32 %v131_v16, 5.0  ;;  %v1139_v31 = vclamps-f32 %v115_v21, 5.0  ;;  %v1556_v61 = vld [vmem:[%s1914_s3] sm:$0xff]   ;;  %v243_v7 = vld [vmem:[%s1915_s4 + $0x8] sm:$0xff]  ;;  %v244_v8 = vld [vmem:[%s1915_s4 + $0x10] sm:$0xff] }
   0xa   :  { %v1156_v37 = vclamps-f32 %v132_v27, 5.0  ;;  %v1157_v38 = vclamps-f32 %v133_v28, 5.0  ;;  %v95_v39 = vsub.f32 %v56_v24, %v1472_v3  ;;  %v1140_v42 = vclamps-f32 %v116_v32, 5.0  ;;  %v242_v62 = vld [vmem:[%s1915_s4] sm:$0xff]  ;;  %1210 = vmatprep.mubr.msk.bf16.mxu0 %vm378_vm0, %v1556_v61  ;;  %v61_v13 = vld [vmem:[%s1911_s0 + $0xc8] sm:$0xff]  ;;  %270 = vperm.xlu1 %1238, %v244_v8   ;;  %v245_v16 = vld [vmem:[%s1915_s4 + $0x18] sm:$0xff] }
   0xb   :  { %v1138_v30 = vclamps-f32 %v114_v20, 5.0  ;;  %v218_v36 = vpack.c.bf16 %v1155_v26, %v1154_v25  ;;  %v1141_v43 = vclamps-f32 %v117_v33, 5.0  ;;  %v96_v44 = vsub.f32 %v57_v29, %v1472_v3  ;;  %v60_v0 = vld [vmem:[%s1911_s0 + $0xc0] sm:$0xff]  ;;  %260 = vperm.xlu0 %1237, %v242_v62   ;;  %v45_v15 = vld [vmem:[%s1911_s0 + $0x48] sm:$0xff]  ;;  %v62_v29 = vld [vmem:[%s1911_s0 + $0xd0] sm:$0xff] }
   0xc   :  { %v219_v45 = vpack.c.bf16 %v1157_v38, %v1156_v37  ;;  %v134_v46 = vmul.f32 %v1479_v6, %v95_v39  ;;  %v79_v47 = vsub.f32 %v40_v34, %v1472_v3  ;;  %v80_v48 = vsub.f32 %v41_v35, %v1472_v3  ;;  %v44_v14 = vld [vmem:[%s1911_s0 + $0x40] sm:$0xff]  ;;  %v247_v27 = vld [vmem:[%s1915_s4 + $0x28] sm:$0xff]  ;;  %v248_v33 = vld [vmem:[%s1915_s4 + $0x30] sm:$0xff] }
   0xd   :  { %v210_v41 = vpack.c.bf16 %v1139_v31, %v1138_v30  ;;  %1226 = vmatprep.subr.msk.bf16.mxu0 %vm378_vm0, %v218_v36  ;;  %v135_v51 = vmul.f32 %v1479_v6, %v96_v44  ;;  %v97_v52 = vsub.f32 %v58_v40, %v1472_v3  ;;  %v211_v56 = vpack.c.bf16 %v1141_v43, %v1140_v42  ;;  %v246_v22 = vld [vmem:[%s1915_s4 + $0x20] sm:$0xff]  ;;  %v63_v38 = vld [vmem:[%s1911_s0 + $0xd8] sm:$0xff]  ;;  %v46_v39 = vld [vmem:[%s1911_s0 + $0x50] sm:$0xff] }
   0xe   :  { %v118_v53 = vmul.f32 %v1479_v6, %v79_v47  ;;  %v119_v54 = vmul.f32 %v1479_v6, %v80_v48  ;;  %v1158_v57 = vclamps-f32 %v134_v46, 5.0  ;;  %v98_v59 = vsub.f32 %v59_v49, %v1472_v3  ;;  %275 = vperm.xlu1 %1238, %v245_v16   ;;  %v47_v40 = vld [vmem:[%s1911_s0 + $0x58] sm:$0xff]  ;;  %v250_v47 = vld [vmem:[%s1915_s4 + $0x40] sm:$0xff]  ;;  %v49_v8 = vld [vmem:[%s1911_s0 + $0x68] sm:$0xff] }
   0xf   :  { %v404_v50 = vsel %vm378_vm0, %v210_v41, 0  ;;  %v1159_v58 = vclamps-f32 %v135_v51, 5.0  ;;  %v136_v63 = vmul.f32 %v1479_v6, %v97_v52  ;;  %v81_v4 = vsub.f32 %v42_v55, %v1472_v3  ;;  %265 = vperm.xlu0 %1237, %v243_v7   ;;  %v249_v41 = vld [vmem:[%s1915_s4 + $0x38] sm:$0xff]  ;;  %v251_v52 = vld [vmem:[%s1915_s4 + $0x48] sm:$0xff]  ;;  %v64_v62 = vld [vmem:[%s1911_s0 + $0xe0] sm:$0xff] }
  0x10   :  { %1195 = vmatpush3.bf16.xpose.msra.mxu0 %v404_v50  ;;  %v1142_v1 = vclamps-f32 %v118_v53, 5.0  ;;  %v1143_v2 = vclamps-f32 %v119_v54, 5.0  ;;  %v82_v5 = vsub.f32 %v43_v60, %v1472_v3  ;;  %v407_v10 = vsel %vm378_vm0, %v211_v56, 0  ;;  %v252_v56 = vld [vmem:[%s1915_s4 + $0x50] sm:$0xff] }
  0x11   :  { %1227 = vmatprep.subr.msk.bf16.mxu0 %vm378_vm0, %v219_v45  ;;  %v220_v11 = vpack.c.bf16 %v1159_v58, %v1158_v57  ;;  %v137_v12 = vmul.f32 %v1479_v6, %v98_v59  ;;  %v99_v17 = vsub.f32 %v60_v0, %v1472_v3  ;;  %v1160_v19 = vclamps-f32 %v136_v63, 5.0  ;;  %v65_v63 = vld [vmem:[%s1911_s0 + $0xe8] sm:$0xff]  ;;  %v253_v0 = vld [vmem:[%s1915_s4 + $0x58] sm:$0xff]  ;;  %v66_v16 = vld [vmem:[%s1911_s0 + $0xf0] sm:$0xff] }
  0x12   :  { %v212_v18 = vpack.c.bf16 %v1143_v2, %v1142_v1  ;;  %v120_v20 = vmul.f32 %v1479_v6, %v81_v4  ;;  %v121_v21 = vmul.f32 %v1479_v6, %v82_v5  ;;  %v100_v24 = vsub.f32 %v61_v13, %v1472_v3  ;;  %285 = vperm.xlu1 %1238, %v247_v27   ;;  %v48_v1 = vld [vmem:[%s1911_s0 + $0x60] sm:$0xff] }
  0x13   :  { %v1161_v23 = vclamps-f32 %v137_v12, 5.0  ;;  %v83_v25 = vsub.f32 %v44_v14, %v1472_v3  ;;  %v84_v26 = vsub.f32 %v45_v15, %v1472_v3  ;;  %v138_v28 = vmul.f32 %v1479_v6, %v99_v17  ;;  %280 = vperm.xlu0 %1237, %v246_v22   ;;  %v254_v2 = vld [vmem:[%s1915_s4 + $0x60] sm:$0xff]  ;;  %v256_v15 = vld [vmem:[%s1915_s4 + $0x70] sm:$0xff] }
  0x14   :  { %v410_v30 = vsel %vm378_vm0, %v212_v18, 0  ;;  %v1144_v31 = vclamps-f32 %v120_v20, 5.0  ;;  %v1145_v32 = vclamps-f32 %v121_v21, 5.0  ;;  %v139_v35 = vmul.f32 %v1479_v6, %v100_v24  ;;  %v67_v18 = vld [vmem:[%s1911_s0 + $0xf8] sm:$0xff] }
  0x15   :  { %v221_v34 = vpack.c.bf16 %v1161_v23, %v1160_v19  ;;  %v122_v36 = vmul.f32 %v1479_v6, %v83_v25  ;;  %v123_v37 = vmul.f32 %v1479_v6, %v84_v26  ;;  %v1162_v42 = vclamps-f32 %v138_v28, 5.0  ;;  %v257_v23 = vld [vmem:[%s1915_s4 + $0x78] sm:$0xff] }
  0x16   :  { %v213_v43 = vpack.c.bf16 %v1145_v32, %v1144_v31  ;;  %v101_v44 = vsub.f32 %v62_v29, %v1472_v3  ;;  %v102_v45 = vsub.f32 %v63_v38, %v1472_v3  ;;  %v85_v46 = vsub.f32 %v46_v39, %v1472_v3  ;;  %295 = vperm.xlu1 %1238, %v249_v41  }
  0x17   :  { %290 = vperm.xlu0 %1237, %v248_v33   ;;  %v1163_v48 = vclamps-f32 %v139_v35, 5.0  ;;  %v1146_v49 = vclamps-f32 %v122_v36, 5.0  ;;  %v1147_v50 = vclamps-f32 %v123_v37, 5.0  ;;  %v86_v51 = vsub.f32 %v47_v40, %v1472_v3 }
  0x18   :  { %1197 = vmatpush3.bf16.xpose.msra.mxu0 %v407_v10  ;;  %v140_v53 = vmul.f32 %v1479_v6, %v101_v44  ;;  %v141_v54 = vmul.f32 %v1479_v6, %v102_v45  ;;  %v124_v55 = vmul.f32 %v1479_v6, %v85_v46  ;;  %v413_v57 = vsel %vm378_vm0, %v213_v43, 0  ;;  %v255_v10 = vld [vmem:[%s1915_s4 + $0x68] sm:$0xff] }
  0x19   :  { %1228 = vmatprep.subr.msk.bf16.mxu0 %vm378_vm0, %v220_v11  ;;  %v222_v58 = vpack.c.bf16 %v1163_v48, %v1162_v42  ;;  %v214_v59 = vpack.c.bf16 %v1147_v50, %v1146_v49  ;;  %v125_v60 = vmul.f32 %v1479_v6, %v86_v51  ;;  %v103_v13 = vsub.f32 %v64_v62, %v1472_v3 }
  0x1a   :  { %305 = vperm.xlu1 %1238, %v251_v52   ;;  %v1164_v4 = vclamps-f32 %v140_v53, 5.0  ;;  %v1165_v5 = vclamps-f32 %v141_v54, 5.0  ;;  %v1148_v7 = vclamps-f32 %v124_v55, 5.0  ;;  %v104_v14 = vsub.f32 %v65_v63, %v1472_v3 }
  0x1b   :  { %300 = vperm.xlu0 %1237, %v250_v47   ;;  %v416_v11 = vsel %vm378_vm0, %v214_v59, 0  ;;  %v1149_v12 = vclamps-f32 %v125_v60, 5.0  ;;  %v87_v17 = vsub.f32 %v48_v1, %v1472_v3  ;;  %v142_v20 = vmul.f32 %v1479_v6, %v103_v13 }
  0x1c   :  { %v223_v19 = vpack.c.bf16 %v1165_v5, %v1164_v4  ;;  %v143_v21 = vmul.f32 %v1479_v6, %v104_v14  ;;  %v88_v22 = vsub.f32 %v49_v8, %v1472_v3 }
  0x1e   :  { %315 = vperm.xlu1 %1238, %v253_v0  }
  0x1f   :  { %310 = vperm.xlu0 %1237, %v252_v56  }
  0x20   :  { %1199 = vmatpush3.bf16.xpose.msra.mxu0 %v410_v30 }
  0x21   :  { %1229 = vmatprep.subr.msk.bf16.mxu0 %vm378_vm0, %v221_v34 }
  0x22   :  { %325 = vperm.xlu1 %1238, %v255_v10  }
  0x23   :  { %320 = vperm.xlu0 %1237, %v254_v2  }
  0x28   :  { %1201 = vmatpush3.bf16.xpose.msra.mxu0 %v413_v57 }
  0x29   :  { %1230 = vmatprep.subr.msk.bf16.mxu0 %vm378_vm0, %v222_v58 }
  0x2a   :  { %16 = vsyncpa [#allocation4], 0  ;;  %330 = vperm.xlu0 %1237, %v256_v15   ;;  %v215_v24 = vpack.c.bf16 %v1149_v12, %v1148_v7  ;;  %v126_v25 = vmul.f32 %v1479_v6, %v87_v17  ;;  %v105_v26 = vsub.f32 %v66_v16, %v1472_v3  ;;  %v628_v27 = vld [vmem:[%s1917_s6] sm:$0xff]  ;;  %v1166_v28 = vclamps-f32 %v142_v20, 5.0  ;;  %v50_v32 = vld [vmem:[%s1911_s0 + $0x70] sm:$0xff]  ;;  %335 = vperm.xlu1 %1238, %v257_v23  }
  0x2b   :  { %v1167_v29 = vclamps-f32 %v143_v21, 5.0  ;;  %v127_v30 = vmul.f32 %v1479_v6, %v88_v22  ;;  %v106_v31 = vsub.f32 %v67_v18, %v1472_v3  ;;  %v51_v33 = vld [vmem:[%s1911_s0 + $0x78] sm:$0xff]  ;;  %v629_v34 = vld [vmem:[%s1917_s6 + $0x8] sm:$0xff]  ;;  %v89_v38 = vsub.f32 %v50_v32, %v1472_v3  ;;  %v630_v39 = vld [vmem:[%s1917_s6 + $0x10] sm:$0xff] }
  0x2c   :  { %v419_v35 = vsel %vm378_vm0, %v215_v24, 0  ;;  %v1150_v36 = vclamps-f32 %v126_v25, 5.0  ;;  %v144_v37 = vmul.f32 %v1479_v6, %v105_v26  ;;  %v90_v43 = vsub.f32 %v51_v33, %v1472_v3  ;;  %v631_v44 = vld [vmem:[%s1917_s6 + $0x18] sm:$0xff]  ;;  %v632_v46 = vld [vmem:[%s1917_s6 + $0x20] sm:$0xff]  ;;  %v633_v50 = vld [vmem:[%s1917_s6 + $0x28] sm:$0xff] }
  0x2d   :  { %v224_v40 = vpack.c.bf16 %v1167_v29, %v1166_v28  ;;  %v1151_v41 = vclamps-f32 %v127_v30, 5.0  ;;  %v145_v42 = vmul.f32 %v1479_v6, %v106_v31  ;;  %v128_v49 = vmul.f32 %v1479_v6, %v89_v38  ;;  %v634_v51 = vld [vmem:[%s1917_s6 + $0x30] sm:$0xff]  ;;  %v917_v56 = vld [vmem:[%s1918_s7] sm:$0xff]  ;;  %v918_v58 = vld [vmem:[%s1918_s7 + $0x8] sm:$0xff] }
  0x2e   :  { %646 = vperm.xlu0 %1237, %v628_v27   ;;  %651 = vperm.xlu1 %1238, %v629_v34   ;;  %v1168_v45 = vclamps-f32 %v144_v37, 5.0  ;;  %v129_v3 = vmul.f32 %v1479_v6, %v90_v43  ;;  %v635_v6 = vld [vmem:[%s1917_s6 + $0x38] sm:$0xff]  ;;  %v636_v59 = vld [vmem:[%s1917_s6 + $0x40] sm:$0xff]  ;;  %v919_v62 = vld [vmem:[%s1918_s7 + $0x10] sm:$0xff] }
  0x2f   :  { %v216_v47 = vpack.c.bf16 %v1151_v41, %v1150_v36  ;;  %v1169_v48 = vclamps-f32 %v145_v42, 5.0  ;;  %v1152_v54 = vclamps-f32 %v128_v49, 5.0  ;;  %v637_v63 = vld [vmem:[%s1917_s6 + $0x48] sm:$0xff]  ;;  %v920_v0 = vld [vmem:[%s1918_s7 + $0x18] sm:$0xff]  ;;  %v638_v2 = vld [vmem:[%s1917_s6 + $0x50] sm:$0xff] }
  0x30   :  { %1203 = vmatpush3.bf16.xpose.msra.mxu0 %v416_v11  ;;  %v1153_v55 = vclamps-f32 %v129_v3, 5.0  ;;  %v1240_v1 = vld [vmem:[%s1914_s3 + $0x8] sm:$0xff]   ;;  %v921_v4 = vld [vmem:[%s1918_s7 + $0x20] sm:$0xff]  ;;  %v639_v5 = vld [vmem:[%s1917_s6 + $0x58] sm:$0xff] }
  0x31   :  { %1231 = vmatprep.subr.msk.bf16.mxu0 %vm378_vm0, %v223_v19  ;;  %v422_v52 = vsel %vm378_vm0, %v216_v47, 0  ;;  %v225_v53 = vpack.c.bf16 %v1169_v48, %v1168_v45  ;;  %v922_v7 = vld [vmem:[%s1918_s7 + $0x28] sm:$0xff]  ;;  %v1241_v8 = vld [vmem:[%s1914_s3 + $0x10] sm:$0xff]   ;;  %v924_v12 = vld [vmem:[%s1918_s7 + $0x38] sm:$0xff] }
  0x32   :  { %656 = vperm.xlu0 %1237, %v630_v39   ;;  %661 = vperm.xlu1 %1238, %v631_v44   ;;  %v217_v57 = vpack.c.bf16 %v1153_v55, %v1152_v54  ;;  %v923_v10 = vld [vmem:[%s1918_s7 + $0x30] sm:$0xff]  ;;  %v641_v11 = vld [vmem:[%s1917_s6 + $0x68] sm:$0xff]  ;;  %v1242_v13 = vld [vmem:[%s1914_s3 + $0x18] sm:$0xff]  }
  0x33   :  { %v642_v14 = vld [vmem:[%s1917_s6 + $0x70] sm:$0xff]  ;;  %v925_v15 = vld [vmem:[%s1918_s7 + $0x40] sm:$0xff]  ;;  %v643_v16 = vld [vmem:[%s1917_s6 + $0x78] sm:$0xff] }
  0x34   :  { %v425_v60 = vsel %vm378_vm0, %v217_v57, 0  ;;  %v926_v17 = vld [vmem:[%s1918_s7 + $0x48] sm:$0xff]  ;;  %v1243_v18 = vld [vmem:[%s1914_s3 + $0x20] sm:$0xff]   ;;  %v927_v19 = vld [vmem:[%s1918_s7 + $0x50] sm:$0xff] }
  0x35   :  { %v928_v20 = vld [vmem:[%s1918_s7 + $0x58] sm:$0xff]  ;;  %v929_v21 = vld [vmem:[%s1918_s7 + $0x60] sm:$0xff]  ;;  %v930_v22 = vld [vmem:[%s1918_s7 + $0x68] sm:$0xff] }
  0x36   :  { %666 = vperm.xlu0 %1237, %v632_v46   ;;  %671 = vperm.xlu1 %1238, %v633_v50   ;;  %v1244_v23 = vld [vmem:[%s1914_s3 + $0x28] sm:$0xff]   ;;  %v931_v24 = vld [vmem:[%s1918_s7 + $0x70] sm:$0xff]  ;;  %v932_v25 = vld [vmem:[%s1918_s7 + $0x78] sm:$0xff] }
  0x37   :  { %v1087_v26 = vld [vmem:[#allocation2] sm:$0x1]  ;;  %v1245_v27 = vld [vmem:[%s1914_s3 + $0x30] sm:$0xff]   ;;  %v1246_v28 = vld [vmem:[%s1914_s3 + $0x38] sm:$0xff]  }
  0x38   :  { %1205 = vmatpush3.bf16.xpose.msra.mxu0 %v419_v35 }
  0x39   :  { %1232 = vmatprep.subr.msk.bf16.mxu0 %vm378_vm0, %v224_v40 }
  0x3a   :  { %676 = vperm.xlu0 %1237, %v634_v51   ;;  %681 = vperm.xlu1 %1238, %v635_v6  }
  0x3e   :  { %935 = vperm.xlu0 %1237, %v917_v56   ;;  %940 = vperm.xlu1 %1238, %v918_v58  }
  0x40   :  { %1207 = vmatpush3.bf16.xpose.msra.mxu0 %v422_v52 }
  0x41   :  { %1233 = vmatprep.subr.msk.bf16.mxu0 %vm378_vm0, %v225_v53 }
  0x42   :  { %686 = vperm.xlu0 %1237, %v636_v59   ;;  %945 = vperm.xlu1 %1238, %v919_v62  }
  0x46   :  { %691 = vperm.xlu0 %1237, %v637_v63   ;;  %950 = vperm.xlu1 %1238, %v920_v0  }
  0x48   :  { %1209 = vmatpush3.bf16.xpose.msra.mxu0 %v425_v60 }
  0x4a   :  { %696 = vperm.xlu0 %1237, %v638_v2   ;;  %955 = vperm.xlu1 %1238, %v921_v4  }
  0x4e   :  { %701 = vperm.xlu0 %1237, %v639_v5   ;;  %960 = vperm.xlu1 %1238, %v922_v7  }
  0x4f   :  { %1211 = vmatmul.mubr.msk.bf16.vlgmr.msra.gmra.mrb[0].mxu0 %vm378_vm0, %v1556_v61  ;;  %v640_v61 = vld [vmem:[%s1917_s6 + $0x60] sm:$0xff] }
  0x50   :  { %1212 = vmatprep.mubr.msk.bf16.mxu0 %vm378_vm0, %v1240_v1 }
  0x52   :  { %706 = vperm.xlu0 %1237, %v640_v61   ;;  %965 = vperm.xlu1 %1238, %v923_v10  }
  0x56   :  { %711 = vperm.xlu0 %1237, %v641_v11   ;;  %970 = vperm.xlu1 %1238, %v924_v12  }
  0x57   :  { %1213 = vmatmul.mubr.msk.bf16.gmra.mrb[4].mxu0 %vm378_vm0, %v1240_v1 }
  0x58   :  { %1214 = vmatprep.mubr.msk.bf16.mxu0 %vm378_vm0, %v1241_v8 }
  0x5a   :  { %716 = vperm.xlu0 %1237, %v642_v14   ;;  %975 = vperm.xlu1 %1238, %v925_v15  }
  0x5e   :  { %721 = vperm.xlu0 %1237, %v643_v16   ;;  %980 = vperm.xlu1 %1238, %v926_v17  }
  0x5f   :  { %1215 = vmatmul.mubr.msk.bf16.gmra.mrb[8].mxu0 %vm378_vm0, %v1241_v8 }
  0x60   :  { %1216 = vmatprep.mubr.msk.bf16.mxu0 %vm378_vm0, %v1242_v13 }
  0x62   :  { %985 = vperm.xlu0 %1237, %v927_v19   ;;  %990 = vperm.xlu1 %1238, %v928_v20  }
  0x66   :  { %995 = vperm.xlu0 %1237, %v929_v21   ;;  %1000 = vperm.xlu1 %1238, %v930_v22  }
  0x67   :  { %1217 = vmatmul.mubr.msk.bf16.gmra.mrb[12].mxu0 %vm378_vm0, %v1242_v13 }
  0x68   :  { %1218 = vmatprep.mubr.msk.bf16.mxu0 %vm378_vm0, %v1243_v18 }
  0x6a   :  { %1005 = vperm.xlu0 %1237, %v931_v24   ;;  %1010 = vperm.xlu1 %1238, %v932_v25  }
  0x6e   :  { %1090 = vperm.xlu0 %1237, %v1087_v26  }
  0x6f   :  { %1219 = vmatmul.mubr.msk.bf16.gmra.mrb[16].mxu0 %vm378_vm0, %v1243_v18 }
  0x70   :  { %1220 = vmatprep.mubr.msk.bf16.mxu0 %vm378_vm0, %v1244_v23 }
  0x77   :  { %1221 = vmatmul.mubr.msk.bf16.gmra.mrb[20].mxu0 %vm378_vm0, %v1244_v23 }
  0x78   :  { %1222 = vmatprep.mubr.msk.bf16.mxu0 %vm378_vm0, %v1245_v27 }
  0x7f   :  { %1223 = vmatmul.mubr.msk.bf16.gmra.mrb[24].mxu0 %vm378_vm0, %v1245_v27 }
  0x80   :  { %1224 = vmatprep.mubr.msk.bf16.mxu0 %vm378_vm0, %v1246_v28 }
  0x87   :  { %1225 = vmatmul.mubr.msk.bf16.gmra.mrb[28].mxu0 %vm378_vm0, %v1246_v28 }
  0x89   :  { %v271_v38 = vpop.permute.xlu1 %270 }
  0x8a   :  { %v261_v29 = vpop.permute.xlu0 %260 }
  0x8d   :  { %v276_v43 = vpop.permute.xlu1 %275 }
  0x8e   :  { %v266_v33 = vpop.permute.xlu0 %265 }
  0x91   :  { %v286_v57 = vpop.permute.xlu1 %285 }
  0x92   :  { %v281_v52 = vpop.permute.xlu0 %280 }
  0x95   :  { %v296_v12 = vpop.permute.xlu1 %295 }
  0x96   :  { %v291_v5 = vpop.permute.xlu0 %290 }
  0x99   :  { %v306_v28 = vpop.permute.xlu1 %305 }
  0x9a   :  { %v301_v22 = vpop.permute.xlu0 %300 }
 0x122   :  { %v485_v30 = vpop.f32.mrb[0].mxu0 }
 0x123   :  { %v486_v31 = vadd.f32 %v485_v30, %v261_v29  ;;  %v487_v32 = vpop.f32.mrb[1].mxu0 }
 0x124   :  { %v488_v34 = vadd.f32 %v487_v32, %v261_v29  ;;  %v489_v35 = vpop.f32.mrb[2].mxu0 }
 0x125   :  { %1255 = vtanh.f32 %v486_v31  ;;  %v490_v36 = vadd.f32 %v489_v35, %v266_v33  ;;  %v491_v37 = vpop.f32.mrb[3].mxu0 }
 0x126   :  { %1257 = vtanh.f32 %v488_v34  ;;  %v492_v39 = vadd.f32 %v491_v37, %v266_v33 }
 0x127   :  { %1259 = vtanh.f32 %v490_v36 }
 0x128   :  { %1261 = vtanh.f32 %v492_v39 }
 0x12a   :  { %v495_v40 = vpop.f32.mrb[4].mxu0 }
 0x12b   :  { %v496_v41 = vadd.f32 %v495_v40, %v271_v38  ;;  %v497_v42 = vpop.f32.mrb[5].mxu0 }
 0x12c   :  { %v498_v44 = vadd.f32 %v497_v42, %v271_v38  ;;  %v499_v45 = vpop.f32.mrb[6].mxu0  ;;  %v311_v38 = vpop.permute.xlu0 %310 }
 0x12d   :  { %1263 = vtanh.f32 %v496_v41  ;;  %v500_v46 = vadd.f32 %v499_v45, %v276_v43  ;;  %v501_v47 = vpop.f32.mrb[7].mxu0 }
 0x12e   :  { %1265 = vtanh.f32 %v498_v44  ;;  %v502_v48 = vadd.f32 %v501_v47, %v276_v43  ;;  %v316_v44 = vpop.permute.xlu1 %315 }
 0x12f   :  { %v1256_v49 = vpop.eup %1255  ;;  %1267 = vtanh.f32 %v500_v46 }
 0x130   :  { %v1258_v3 = vpop.eup %1257  ;;  %1269 = vtanh.f32 %v502_v48 }
 0x131   :  { %v1260_v50 = vpop.eup %1259 }
 0x132   :  { %v1262_v51 = vpop.eup %1261  ;;  %v505_v53 = vpop.f32.mrb[8].mxu0  ;;  %v612_v54 = vpack.c.bf16 %v1260_v50, %v1256_v49 }
 0x133   :  { %v506_v55 = vadd.f32 %v505_v53, %v281_v52  ;;  %v507_v6 = vpop.f32.mrb[9].mxu0  ;;  %v613_v56 = vpack.c.bf16 %v1262_v51, %v1258_v3  ;;  %v321_v53 = vpop.permute.xlu0 %320 }
 0x134   :  { %v508_v58 = vadd.f32 %v507_v6, %v281_v52  ;;  %v509_v59 = vpop.f32.mrb[10].mxu0 }
 0x135   :  { %1271 = vtanh.f32 %v506_v55  ;;  %v510_v60 = vadd.f32 %v509_v59, %v286_v57  ;;  %v511_v62 = vpop.f32.mrb[11].mxu0  ;;  %772 = vmatprep.subr.bf16.mxu1 %v613_v56 }
 0x136   :  { %1273 = vtanh.f32 %v508_v58  ;;  %v512_v63 = vadd.f32 %v511_v62, %v286_v57  ;;  %773 = vmatpush1.bf16.msra.mxu1 %v612_v54  ;;  %v326_v58 = vpop.permute.xlu1 %325 }
 0x137   :  { %v1264_v0 = vpop.eup %1263  ;;  %1275 = vtanh.f32 %v510_v60 }
 0x138   :  { %v1266_v1 = vpop.eup %1265  ;;  %1277 = vtanh.f32 %v512_v63 }
 0x139   :  { %v1268_v2 = vpop.eup %1267 }
 0x13a   :  { %v1270_v4 = vpop.eup %1269  ;;  %v515_v7 = vpop.f32.mrb[12].mxu0  ;;  %v614_v8 = vpack.c.bf16 %v1268_v2, %v1264_v0 }
 0x13b   :  { %v516_v61 = vadd.f32 %v515_v7, %v291_v5  ;;  %v517_v10 = vpop.f32.mrb[13].mxu0  ;;  %v615_v11 = vpack.c.bf16 %v1270_v4, %v1266_v1  ;;  %v331_v7 = vpop.permute.xlu0 %330 }
 0x13c   :  { %v518_v13 = vadd.f32 %v517_v10, %v291_v5  ;;  %v519_v14 = vpop.f32.mrb[14].mxu0 }
 0x13d   :  { %1279 = vtanh.f32 %v516_v61  ;;  %v520_v15 = vadd.f32 %v519_v14, %v296_v12  ;;  %v521_v16 = vpop.f32.mrb[15].mxu0  ;;  %774 = vmatprep.subr.bf16.mxu1 %v615_v11 }
 0x13e   :  { %1281 = vtanh.f32 %v518_v13  ;;  %v522_v17 = vadd.f32 %v521_v16, %v296_v12  ;;  %775 = vmatpush1.bf16.msra.mxu1 %v614_v8  ;;  %v336_v13 = vpop.permute.xlu1 %335 }
 0x13f   :  { %v1272_v18 = vpop.eup %1271  ;;  %1283 = vtanh.f32 %v520_v15 }
 0x140   :  { %v1274_v19 = vpop.eup %1273  ;;  %1285 = vtanh.f32 %v522_v17 }
 0x141   :  { %v1276_v20 = vpop.eup %1275 }
 0x142   :  { %v1278_v21 = vpop.eup %1277  ;;  %v525_v23 = vpop.f32.mrb[16].mxu0  ;;  %v616_v24 = vpack.c.bf16 %v1276_v20, %v1272_v18 }
 0x143   :  { %v526_v25 = vadd.f32 %v525_v23, %v301_v22  ;;  %v527_v26 = vpop.f32.mrb[17].mxu0  ;;  %v617_v27 = vpack.c.bf16 %v1278_v21, %v1274_v19 }
 0x144   :  { %v528_v29 = vadd.f32 %v527_v26, %v301_v22  ;;  %v529_v30 = vpop.f32.mrb[18].mxu0 }
 0x145   :  { %1287 = vtanh.f32 %v526_v25  ;;  %v530_v31 = vadd.f32 %v529_v30, %v306_v28  ;;  %v531_v32 = vpop.f32.mrb[19].mxu0  ;;  %776 = vmatprep.subr.bf16.mxu1 %v617_v27 }
 0x146   :  { %1289 = vtanh.f32 %v528_v29  ;;  %v532_v33 = vadd.f32 %v531_v32, %v306_v28  ;;  %777 = vmatpush1.bf16.msra.mxu1 %v616_v24  ;;  %v1248_v32 = vld [vmem:[%s1916_s5 + $0x8] sm:$0xff]  }
 0x147   :  { %v1280_v34 = vpop.eup %1279  ;;  %1291 = vtanh.f32 %v530_v31  ;;  %v1247_v31 = vld [vmem:[%s1916_s5] sm:$0xff]  }
 0x148   :  { %v1282_v35 = vpop.eup %1281  ;;  %1293 = vtanh.f32 %v532_v33  ;;  %v1249_v33 = vld [vmem:[%s1916_s5 + $0x10] sm:$0xff]  }
 0x149   :  { %v1284_v36 = vpop.eup %1283 }
 0x14a   :  { %v1286_v37 = vpop.eup %1285  ;;  %v535_v39 = vpop.f32.mrb[20].mxu0  ;;  %v618_v40 = vpack.c.bf16 %v1284_v36, %v1280_v34  ;;  %v1250_v34 = vld [vmem:[%s1916_s5 + $0x18] sm:$0xff]   ;;  %v1252_v36 = vld [vmem:[%s1916_s5 + $0x28] sm:$0xff]  }
 0x14b   :  { %v536_v41 = vadd.f32 %v535_v39, %v311_v38  ;;  %v537_v42 = vpop.f32.mrb[21].mxu0  ;;  %v619_v43 = vpack.c.bf16 %v1286_v37, %v1282_v35  ;;  %v1251_v35 = vld [vmem:[%s1916_s5 + $0x20] sm:$0xff]   ;;  %v1253_v37 = vld [vmem:[%s1916_s5 + $0x30] sm:$0xff]   ;;  %v647_v39 = vpop.permute.xlu0 %646 }
 0x14c   :  { %v538_v45 = vadd.f32 %v537_v42, %v311_v38  ;;  %v539_v46 = vpop.f32.mrb[22].mxu0  ;;  %v1254_v38 = vld [vmem:[%s1916_s5 + $0x38] sm:$0xff]   ;;  %s1409_s5 = smov [#allocation3]  }
 0x14d   :  { %1295 = vtanh.f32 %v536_v41  ;;  %v540_v47 = vadd.f32 %v539_v46, %v316_v44  ;;  %v541_v48 = vpop.f32.mrb[23].mxu0  ;;  %778 = vmatprep.subr.bf16.mxu1 %v619_v43  ;;  %s1128_s24 = sshll.u32 %s1409_s5, 4  ;;  %s1129_s24 = int_to_ptr.vmem [resolvable:$true] %s1128_s24 }
 0x14e   :  { %1297 = vtanh.f32 %v538_v45  ;;  %v542_v49 = vadd.f32 %v541_v48, %v316_v44  ;;  %779 = vmatpush1.bf16.msra.mxu1 %v618_v40  ;;  %v652_v40 = vpop.permute.xlu1 %651  ;;  %s1383_s25 = scalar_lea.vmem %s1129_s24, 32  ;;  %p1388_p1 = scmp.lt.s32.totalorder %s1129_s24, %s1129_s24 }
 0x14f   :  { %v1288_v3 = vpop.eup %1287  ;;  %1299 = vtanh.f32 %v540_v47  ;;  %v657_v41 = vpop.permute.xlu0 %656  ;;  %p1384_p0 = scmp.ne.s32.totalorder %s1129_s24, %s1383_s25  ;;  %p1389_p2 = scmp.lt.s32.totalorder %s1383_s25, %s1383_s25 }
 0x150   :  { %v1290_v50 = vpop.eup %1289  ;;  %1301 = vtanh.f32 %v542_v49 }
 0x151   :  { %v1292_v51 = vpop.eup %1291  ;;  %p1390_p3 = por %p1389_p2, %p1388_p1 }
 0x152   :  { %v1294_v52 = vpop.eup %1293  ;;  %v545_v54 = vpop.f32.mrb[24].mxu0  ;;  %v620_v55 = vpack.c.bf16 %v1292_v51, %v1288_v3 }
 0x153   :  { %v546_v6 = vadd.f32 %v545_v54, %v321_v53  ;;  %v547_v56 = vpop.f32.mrb[25].mxu0  ;;  %v621_v57 = vpack.c.bf16 %v1294_v52, %v1290_v50  ;;  %v662_v42 = vpop.permute.xlu1 %661  ;;  %p1391_p4 = pnand %p1390_p3, %p1384_p0 }
 0x154   :  { %v548_v59 = vadd.f32 %v547_v56, %v321_v53  ;;  %v549_v60 = vpop.f32.mrb[26].mxu0  ;;  %v667_v43 = vpop.permute.xlu0 %666 }
 0x155   :  { %1303 = vtanh.f32 %v546_v6  ;;  %v550_v62 = vadd.f32 %v549_v60, %v326_v58  ;;  %v551_v63 = vpop.f32.mrb[27].mxu0  ;;  %780 = vmatprep.subr.bf16.mxu1 %v621_v57 }
 0x156   :  { %1305 = vtanh.f32 %v548_v59  ;;  %v552_v0 = vadd.f32 %v551_v63, %v326_v58  ;;  %781 = vmatpush1.bf16.msra.mxu1 %v620_v55 }
 0x157   :  { %v1296_v1 = vpop.eup %1295  ;;  %1307 = vtanh.f32 %v550_v62  ;;  %v672_v44 = vpop.permute.xlu1 %671 }
 0x158   :  { %v1298_v2 = vpop.eup %1297  ;;  %1309 = vtanh.f32 %v552_v0  ;;  %v1871_v45 = vpop.permute.xlu0 %676 }
 0x159   :  { %v1300_v4 = vpop.eup %1299 }
 0x15a   :  { %v1302_v5 = vpop.eup %1301  ;;  %v555_v8 = vpop.f32.mrb[28].mxu0  ;;  %v622_v61 = vpack.c.bf16 %v1300_v4, %v1296_v1 }
 0x15b   :  { %v556_v10 = vadd.f32 %v555_v8, %v331_v7  ;;  %v557_v11 = vpop.f32.mrb[29].mxu0  ;;  %v623_v12 = vpack.c.bf16 %v1302_v5, %v1298_v2  ;;  %v1873_v46 = vpop.permute.xlu1 %681 }
 0x15c   :  { %v558_v14 = vadd.f32 %v557_v11, %v331_v7  ;;  %v559_v15 = vpop.f32.mrb[30].mxu0  ;;  %v936_v47 = vpop.permute.xlu0 %935 }
 0x15d   :  { %1311 = vtanh.f32 %v556_v10  ;;  %v560_v16 = vadd.f32 %v559_v15, %v336_v13  ;;  %v561_v17 = vpop.f32.mrb[31].mxu0  ;;  %782 = vmatprep.subr.bf16.mxu1 %v623_v12 }
 0x15e   :  { %1313 = vtanh.f32 %v558_v14  ;;  %v562_v18 = vadd.f32 %v561_v17, %v336_v13  ;;  %783 = vmatpush1.bf16.msra.mxu1 %v622_v61 }
 0x15f   :  { %v1304_v19 = vpop.eup %1303  ;;  %1315 = vtanh.f32 %v560_v16  ;;  %v941_v48 = vpop.permute.xlu1 %940 }
 0x160   :  { %v1306_v20 = vpop.eup %1305  ;;  %1317 = vtanh.f32 %v562_v18  ;;  %v1875_v54 = vpop.permute.xlu0 %686 }
 0x161   :  { %v1308_v21 = vpop.eup %1307 }
 0x162   :  { %v1310_v22 = vpop.eup %1309  ;;  %v624_v23 = vpack.c.bf16 %v1308_v21, %v1304_v19 }
 0x163   :  { %v625_v24 = vpack.c.bf16 %v1310_v22, %v1306_v20  ;;  %v946_v6 = vpop.permute.xlu1 %945 }
 0x164   :  { %v1877_v59 = vpop.permute.xlu0 %691 }
 0x165   :  { %784 = vmatprep.subr.bf16.mxu1 %v625_v24 }
 0x166   :  { %785 = vmatpush1.bf16.msra.mxu1 %v624_v23 }
 0x167   :  { %v1312_v25 = vpop.eup %1311  ;;  %v951_v63 = vpop.permute.xlu1 %950 }
 0x168   :  { %v1314_v26 = vpop.eup %1313  ;;  %v1879_v61 = vpop.permute.xlu0 %696 }
 0x169   :  { %v1316_v27 = vpop.eup %1315 }
 0x16a   :  { %v1318_v28 = vpop.eup %1317  ;;  %v626_v29 = vpack.c.bf16 %v1316_v27, %v1312_v25 }
 0x16b   :  { %v627_v30 = vpack.c.bf16 %v1318_v28, %v1314_v26  ;;  %v956_v13 = vpop.permute.xlu1 %955 }
 0x16c   :  { %v1881_v27 = vpop.permute.xlu0 %701 }
 0x16d   :  { %786 = vmatprep.subr.bf16.mxu1 %v627_v30 }
 0x16e   :  { %787 = vmatpush1.bf16.msra.mxu1 %v626_v29 }
 0x16f   :  { %v961_v30 = vpop.permute.xlu1 %960 }
 0x171   :  { %805 = vmatmul.mubr.bf16.vlgmr.msra.gmra.mrb[0].mxu1 %v1247_v31 }
 0x172   :  { %814 = vmatprep.mubr.bf16.mxu1 %v1407_v9 }
 0x179   :  { %815 = vmatmul.mubr.bf16.gmra.mrb[4].mxu1 %v1248_v32 }
 0x17a   :  { %824 = vmatprep.mubr.bf16.mxu1 %v1407_v9 }
 0x181   :  { %825 = vmatmul.mubr.bf16.gmra.mrb[8].mxu1 %v1249_v33 }
 0x182   :  { %834 = vmatprep.mubr.bf16.mxu1 %v1407_v9 }
 0x189   :  { %835 = vmatmul.mubr.bf16.gmra.mrb[12].mxu1 %v1250_v34 }
 0x18a   :  { %844 = vmatprep.mubr.bf16.mxu1 %v1407_v9 }
 0x191   :  { %845 = vmatmul.mubr.bf16.gmra.mrb[16].mxu1 %v1251_v35 }
 0x192   :  { %854 = vmatprep.mubr.bf16.mxu1 %v1407_v9 }
 0x199   :  { %855 = vmatmul.mubr.bf16.gmra.mrb[20].mxu1 %v1252_v36 }
 0x19a   :  { %864 = vmatprep.mubr.bf16.mxu1 %v1407_v9 }
 0x1a1   :  { %865 = vmatmul.mubr.bf16.gmra.mrb[24].mxu1 %v1253_v37 }
 0x1a2   :  { %874 = vmatprep.mubr.bf16.mxu1 %v1407_v9 }
 0x1a9   :  { %875 = vmatmul.mubr.bf16.gmra.mrb[28].mxu1 %v1254_v38 }
 0x244   :  { %v806_v49 = vpop.f32.mrb[0].mxu1 }
 0x245   :  { %v807_v3 = vadd.f32 %v806_v49, %v647_v39  ;;  %v808_v9 = vpop.f32.mrb[1].mxu1 }
 0x246   :  { %v809_v50 = vadd.f32 %v808_v9, %v647_v39  ;;  %v810_v51 = vpop.f32.mrb[2].mxu1  ;;  %v966_v9 = vpop.permute.xlu1 %965 }
 0x247   :  { %1319 = vtanh.f32 %v807_v3  ;;  %v811_v52 = vadd.f32 %v810_v51, %v652_v40  ;;  %v812_v53 = vpop.f32.mrb[3].mxu1 }
 0x248   :  { %1321 = vtanh.f32 %v809_v50  ;;  %v813_v55 = vadd.f32 %v812_v53, %v652_v40 }
 0x249   :  { %1323 = vtanh.f32 %v811_v52 }
 0x24a   :  { %1325 = vtanh.f32 %v813_v55 }
 0x24c   :  { %v816_v56 = vpop.f32.mrb[4].mxu1 }
 0x24d   :  { %v817_v57 = vadd.f32 %v816_v56, %v657_v41  ;;  %v818_v58 = vpop.f32.mrb[5].mxu1 }
 0x24e   :  { %v819_v60 = vadd.f32 %v818_v58, %v657_v41  ;;  %v820_v62 = vpop.f32.mrb[6].mxu1 }
 0x24f   :  { %1327 = vtanh.f32 %v817_v57  ;;  %v821_v0 = vadd.f32 %v820_v62, %v662_v42  ;;  %v822_v1 = vpop.f32.mrb[7].mxu1 }
 0x250   :  { %1329 = vtanh.f32 %v819_v60  ;;  %v823_v2 = vadd.f32 %v822_v1, %v662_v42 }
 0x251   :  { %v1320_v4 = vpop.eup %1319  ;;  %1331 = vtanh.f32 %v821_v0 }
 0x252   :  { %v1322_v5 = vpop.eup %1321  ;;  %1333 = vtanh.f32 %v823_v2  ;;  %v1013_v10 = vmul.f32 %v1320_v4, %v936_v47  ;;  %v971_v2 = vpop.permute.xlu1 %970 }
 0x253   :  { %v1324_v7 = vpop.eup %1323  ;;  %v1014_v14 = vmul.f32 %v1322_v5, %v936_v47 }
 0x254   :  { %v1326_v8 = vpop.eup %1325  ;;  %v1015_v11 = vmul.f32 %v1324_v7, %v941_v48  ;;  %v826_v12 = vpop.f32.mrb[8].mxu1 }
 0x255   :  { %v1016_v15 = vmul.f32 %v1326_v8, %v941_v48  ;;  %v827_v16 = vadd.f32 %v826_v12, %v667_v43  ;;  %v828_v17 = vpop.f32.mrb[9].mxu1  ;;  %v1886_v48 = vpop.permute.xlu0 %706 }
 0x256   :  { %v1045_v18 = vadd.f32 %v1015_v11, %v1013_v10  ;;  %v829_v19 = vadd.f32 %v828_v17, %v667_v43  ;;  %v830_v20 = vpop.f32.mrb[10].mxu1 }
 0x257   :  { %v1066_v21 = vadd.f32 %v1016_v15, %v1014_v14  ;;  %1335 = vtanh.f32 %v827_v16  ;;  %v831_v22 = vadd.f32 %v830_v20, %v672_v44  ;;  %v832_v23 = vpop.f32.mrb[11].mxu1 }
 0x258   :  { %1337 = vtanh.f32 %v829_v19  ;;  %v833_v24 = vadd.f32 %v832_v23, %v672_v44  ;;  %v976_v19 = vpop.permute.xlu1 %975 }
 0x259   :  { %v1328_v25 = vpop.eup %1327  ;;  %1339 = vtanh.f32 %v831_v22 }
 0x25a   :  { %v1330_v26 = vpop.eup %1329  ;;  %v1017_v28 = vmul.f32 %v1328_v25, %v946_v6  ;;  %1341 = vtanh.f32 %v833_v24 }
 0x25b   :  { %v1332_v29 = vpop.eup %1331  ;;  %v1018_v31 = vmul.f32 %v1330_v26, %v946_v6 }
 0x25c   :  { %v1334_v32 = vpop.eup %1333  ;;  %v1046_v33 = vadd.f32 %v1045_v18, %v1017_v28  ;;  %v1019_v34 = vmul.f32 %v1332_v29, %v951_v63  ;;  %v836_v35 = vpop.f32.mrb[12].mxu1 }
 0x25d   :  { %v1067_v36 = vadd.f32 %v1066_v21, %v1018_v31  ;;  %v1020_v37 = vmul.f32 %v1334_v32, %v951_v63  ;;  %v837_v38 = vadd.f32 %v836_v35, %v1871_v45  ;;  %v838_v39 = vpop.f32.mrb[13].mxu1  ;;  %v712_v63 = vpop.permute.xlu0 %711 }
 0x25e   :  { %v1047_v40 = vadd.f32 %v1046_v33, %v1019_v34  ;;  %v839_v41 = vadd.f32 %v838_v39, %v1871_v45  ;;  %v840_v42 = vpop.f32.mrb[14].mxu1 }
 0x25f   :  { %v1068_v43 = vadd.f32 %v1067_v36, %v1020_v37  ;;  %1343 = vtanh.f32 %v837_v38  ;;  %v841_v44 = vadd.f32 %v840_v42, %v1873_v46  ;;  %v842_v47 = vpop.f32.mrb[15].mxu1  ;;  %v981_v36 = vpop.permute.xlu1 %980 }
 0x260   :  { %1345 = vtanh.f32 %v839_v41  ;;  %v843_v49 = vadd.f32 %v842_v47, %v1873_v46 }
 0x261   :  { %v1336_v3 = vpop.eup %1335  ;;  %1347 = vtanh.f32 %v841_v44  ;;  %v717_v16 = vpop.permute.xlu0 %716 }
 0x262   :  { %v1338_v50 = vpop.eup %1337  ;;  %v1021_v51 = vmul.f32 %v1336_v3, %v956_v13  ;;  %1349 = vtanh.f32 %v843_v49 }
 0x263   :  { %v1340_v52 = vpop.eup %1339  ;;  %v1022_v53 = vmul.f32 %v1338_v50, %v956_v13 }
 0x264   :  { %v1342_v45 = vpop.eup %1341  ;;  %v1048_v55 = vadd.f32 %v1047_v40, %v1021_v51  ;;  %v1023_v6 = vmul.f32 %v1340_v52, %v961_v30  ;;  %v846_v56 = vpop.f32.mrb[16].mxu1 }
 0x265   :  { %v1069_v57 = vadd.f32 %v1068_v43, %v1022_v53  ;;  %v1024_v58 = vmul.f32 %v1342_v45, %v961_v30  ;;  %v847_v60 = vadd.f32 %v846_v56, %v1875_v54  ;;  %v848_v62 = vpop.f32.mrb[17].mxu1  ;;  %v722_v35 = vpop.permute.xlu0 %721 }
 0x266   :  { %v1049_v0 = vadd.f32 %v1048_v55, %v1023_v6  ;;  %v849_v46 = vadd.f32 %v848_v62, %v1875_v54  ;;  %v850_v1 = vpop.f32.mrb[18].mxu1  ;;  %v991_v56 = vpop.permute.xlu1 %990 }
 0x267   :  { %v1070_v4 = vadd.f32 %v1069_v57, %v1024_v58  ;;  %1351 = vtanh.f32 %v847_v60  ;;  %v851_v5 = vadd.f32 %v850_v1, %v1877_v59  ;;  %v852_v7 = vpop.f32.mrb[19].mxu1 }
 0x268   :  { %1353 = vtanh.f32 %v849_v46  ;;  %v853_v8 = vadd.f32 %v852_v7, %v1877_v59 }
 0x269   :  { %v1344_v10 = vpop.eup %1343  ;;  %1355 = vtanh.f32 %v851_v5  ;;  %v986_v53 = vpop.permute.xlu0 %985 }
 0x26a   :  { %v1346_v11 = vpop.eup %1345  ;;  %v1025_v12 = vmul.f32 %v1344_v10, %v966_v9  ;;  %1357 = vtanh.f32 %v853_v8 }
 0x26b   :  { %v1348_v13 = vpop.eup %1347  ;;  %v1026_v14 = vmul.f32 %v1346_v11, %v966_v9 }
 0x26c   :  { %v1350_v15 = vpop.eup %1349  ;;  %v1050_v54 = vadd.f32 %v1049_v0, %v1025_v12  ;;  %v1027_v17 = vmul.f32 %v1348_v13, %v971_v2  ;;  %v856_v18 = vpop.f32.mrb[20].mxu1 }
 0x26d   :  { %v1071_v20 = vadd.f32 %v1070_v4, %v1026_v14  ;;  %v1028_v21 = vmul.f32 %v1350_v15, %v971_v2  ;;  %v857_v22 = vadd.f32 %v856_v18, %v1879_v61  ;;  %v858_v23 = vpop.f32.mrb[21].mxu1  ;;  %v996_v13 = vpop.permute.xlu0 %995 }
 0x26e   :  { %v1051_v24 = vadd.f32 %v1050_v54, %v1027_v17  ;;  %v859_v59 = vadd.f32 %v858_v23, %v1879_v61  ;;  %v860_v25 = vpop.f32.mrb[22].mxu1  ;;  %v1001_v17 = vpop.permute.xlu1 %1000 }
 0x26f   :  { %v1072_v26 = vadd.f32 %v1071_v20, %v1028_v21  ;;  %1359 = vtanh.f32 %v857_v22  ;;  %v861_v28 = vadd.f32 %v860_v25, %v1881_v27  ;;  %v862_v29 = vpop.f32.mrb[23].mxu1 }
 0x270   :  { %1361 = vtanh.f32 %v859_v59  ;;  %v863_v30 = vadd.f32 %v862_v29, %v1881_v27 }
 0x271   :  { %v1352_v31 = vpop.eup %1351  ;;  %1363 = vtanh.f32 %v861_v28  ;;  %v1006_v25 = vpop.permute.xlu0 %1005 }
 0x272   :  { %v1354_v32 = vpop.eup %1353  ;;  %v1029_v33 = vmul.f32 %v1352_v31, %v976_v19  ;;  %1365 = vtanh.f32 %v863_v30  ;;  %v1011_v30 = vpop.permute.xlu1 %1010 }
 0x273   :  { %v1356_v34 = vpop.eup %1355  ;;  %v1030_v37 = vmul.f32 %v1354_v32, %v976_v19 }
 0x274   :  { %v1358_v38 = vpop.eup %1357  ;;  %v1052_v61 = vadd.f32 %v1051_v24, %v1029_v33  ;;  %v1031_v39 = vmul.f32 %v1356_v34, %v981_v36  ;;  %v866_v40 = vpop.f32.mrb[24].mxu1 }
 0x275   :  { %v1073_v41 = vadd.f32 %v1072_v26, %v1030_v37  ;;  %v1032_v42 = vmul.f32 %v1358_v38, %v981_v36  ;;  %v867_v43 = vadd.f32 %v866_v40, %v1886_v48  ;;  %v868_v44 = vpop.f32.mrb[25].mxu1  ;;  %v1093_v37 = vlaneseq }
 0x276   :  { %v1053_v47 = vadd.f32 %v1052_v61, %v1031_v39  ;;  %v869_v27 = vadd.f32 %v868_v44, %v1886_v48  ;;  %v870_v49 = vpop.f32.mrb[26].mxu1 }
 0x277   :  { %v1074_v3 = vadd.f32 %v1073_v41, %v1032_v42  ;;  %1367 = vtanh.f32 %v867_v43  ;;  %v871_v9 = vadd.f32 %v870_v49, %v712_v63  ;;  %v872_v50 = vpop.f32.mrb[27].mxu1  ;;  %v1094_v41 = vshrl.u32 %v1093_v37, 7 }
 0x278   :  { %1369 = vtanh.f32 %v869_v27  ;;  %v873_v51 = vadd.f32 %v872_v50, %v712_v63  ;;  %v1408_v27 = vmov 1966171168   ;;  %v1091_v50 = vpop.permute.xlu0 %1090  ;;  %vm1119_vm1 = vcmp.lt.s32.totalorder %v1093_v37, 256 }
 0x279   :  { %v1360_v52 = vpop.eup %1359  ;;  %1371 = vtanh.f32 %v871_v9  ;;  %v1103_v49 = vunpack.c.l.s4 %v1408_v27 }
 0x27a   :  { %v1362_v45 = vpop.eup %1361  ;;  %v1033_v55 = vmul.f32 %v1360_v52, %v986_v53  ;;  %1373 = vtanh.f32 %v873_v51 }
 0x27b   :  { %v1364_v6 = vpop.eup %1363  ;;  %v1034_v57 = vmul.f32 %v1362_v45, %v986_v53  ;;  %v1104_v45 = vunpack.c.0.s8 %v1103_v49 }
 0x27c   :  { %v1366_v58 = vpop.eup %1365  ;;  %v1054_v60 = vadd.f32 %v1053_v47, %v1033_v55  ;;  %v1035_v62 = vmul.f32 %v1364_v6, %v991_v56  ;;  %v876_v48 = vpop.f32.mrb[28].mxu1 }
 0x27d   :  { %v1075_v0 = vadd.f32 %v1074_v3, %v1034_v57  ;;  %v1036_v46 = vmul.f32 %v1366_v58, %v991_v56  ;;  %v877_v1 = vadd.f32 %v876_v48, %v717_v16  ;;  %v878_v2 = vpop.f32.mrb[29].mxu1  ;;  %v1095_v3 = vsub.s32 0, %v1094_v41 }
 0x27e   :  { %v1055_v4 = vadd.f32 %v1054_v60, %v1035_v62  ;;  %v879_v5 = vadd.f32 %v878_v2, %v717_v16  ;;  %v880_v63 = vpop.f32.mrb[30].mxu1  ;;  %v1107_v60 = vsub.s32 %v1104_v45, %v1094_v41 }
 0x27f   :  { %v1076_v7 = vadd.f32 %v1075_v0, %v1036_v46  ;;  %1375 = vtanh.f32 %v877_v1  ;;  %v881_v8 = vadd.f32 %v880_v63, %v722_v35  ;;  %v882_v10 = vpop.f32.mrb[31].mxu1  ;;  %v1096_v55 = vrot.slane %v1091_v50, %v1095_v3 }
 0x280   :  { %1377 = vtanh.f32 %v879_v5  ;;  %v883_v11 = vadd.f32 %v882_v10, %v722_v35 }
 0x281   :  { %v1368_v12 = vpop.eup %1367  ;;  %1379 = vtanh.f32 %v881_v8 }
 0x282   :  { %v1370_v14 = vpop.eup %1369  ;;  %v1037_v15 = vmul.f32 %v1368_v12, %v996_v13  ;;  %1381 = vtanh.f32 %v883_v11 }
 0x283   :  { %v1372_v54 = vpop.eup %1371  ;;  %v1038_v18 = vmul.f32 %v1370_v14, %v996_v13 }
 0x284   :  { %v1374_v19 = vpop.eup %1373  ;;  %v1056_v20 = vadd.f32 %v1055_v4, %v1037_v15  ;;  %v1039_v21 = vmul.f32 %v1372_v54, %v1001_v17 }
 0x285   :  { %v1077_v16 = vadd.f32 %v1076_v7, %v1038_v18  ;;  %v1040_v22 = vmul.f32 %v1374_v19, %v1001_v17 }
 0x286   :  { %v1057_v23 = vadd.f32 %v1056_v20, %v1039_v21 }
 0x287   :  { %v1078_v24 = vadd.f32 %v1077_v16, %v1040_v22 }
 0x289   :  { %v1376_v59 = vpop.eup %1375 }
 0x28a   :  { %v1378_v26 = vpop.eup %1377  ;;  %v1041_v28 = vmul.f32 %v1376_v59, %v1006_v25 }
 0x28b   :  { %v1380_v29 = vpop.eup %1379  ;;  %v1042_v31 = vmul.f32 %v1378_v26, %v1006_v25 }
 0x28c   :  { %v1382_v32 = vpop.eup %1381  ;;  %v1058_v33 = vadd.f32 %v1057_v23, %v1041_v28  ;;  %v1043_v34 = vmul.f32 %v1380_v29, %v1011_v30 }
 0x28d   :  { %v1079_v35 = vadd.f32 %v1078_v24, %v1042_v31  ;;  %v1044_v36 = vmul.f32 %v1382_v32, %v1011_v30 }
 0x28e   :  { %v1059_v38 = vadd.f32 %v1058_v33, %v1043_v34 }
 0x28f   :  { %v1080_v61 = vadd.f32 %v1079_v35, %v1044_v36 }
 0x290   :  { %v1060_v39 = vrot.slane %v1059_v38, 4 }
 0x291   :  { %v1081_v40 = vrot.slane %v1080_v61, 4 }
 0x292   :  { %v1061_v42 = vadd.f32 %v1060_v39, %v1059_v38 }
 0x293   :  { %v1082_v43 = vadd.f32 %v1081_v40, %v1080_v61 }
 0x294   :  { %v1062_v44 = vrot.slane %v1061_v42, 2 }
 0x295   :  { %v1083_v47 = vrot.slane %v1082_v43, 2 }
 0x296   :  { %v1063_v9 = vadd.f32 %v1062_v44, %v1061_v42 }
 0x297   :  { %v1084_v51 = vadd.f32 %v1083_v47, %v1082_v43 }
 0x298   :  { %v1064_v52 = vrot.slane %v1063_v9, 1 }
 0x299   :  { %v1085_v53 = vrot.slane %v1084_v51, 1 }
 0x29a   :  { %v1065_v6 = vadd.f32 %v1064_v52, %v1063_v9 }
 0x29b   :  { %v1086_v56 = vadd.f32 %v1085_v53, %v1084_v51 }
 0x29c   :  { %v1097_v57 = vadd.f32 %v1096_v55, %v1065_v6 }
 0x29d   :  { %v1098_v58 = vadd.f32 %v1096_v55, %v1086_v56 }
 0x29f   :  { %v1101_v62 = vcombine.low %v1097_v57, %v1098_v58 }
 0x2a1   :  { %v1108_v48 = vrot.slane %v1101_v62, %v1107_v60 }
 0x2a3   :  { %v1115_v0 = vrot.slane %v1108_v48, %v1107_v60 }
 0x2a5   :  { %1121 = vst.msk [vmem:[#allocation3] sm:$0x3] %vm1119_vm1, %v1115_v0 }
 0x2a6   :  { %1394 = shalt.err (!%p1391_p4)
}
 0x2a7   :  { %s1395_s28 = scalar_lea.hbm %s1920_s9, 32 }
 0x2a8   :  { %p1396_p5 = scmp.ne.s32.totalorder %s1920_s9, %s1395_s28  ;;  %p1399_p6 = scmp.lt.u32.totalorder %s1395_s28, %s1920_s9 }
 0x2aa   :  { %p1401_p7 = pnand %p1399_p6, %p1396_p5 }
 0x2ac   :  { %1404 = shalt.err (!%p1401_p7)
}
 0x2ad   :  { %1131 = dma.vmem_to_hbm [thread:$0]  %s1129_s24, 32, %s1920_s9, [#allocation4]  }
 0x2ae   :  { %1405 = dma.done.wait [#allocation4], 32  }
 0x2af   :  { %1406 = vsyncadd [#allocation4], 4294967264 }
 0x2b0   :  { %1135 = vsyncpa [#allocation4], 1 }

</bundles_post_ra>
